<compile_context>
chip_gen: v7x
topology: tpu7x:2x2x1
jax: 0.10.0
libtpu: 0.0.40
codegen_flags: <defaults>
</compile_context>

<pallas_src>
import jax
import jax.numpy as jnp
from jax.experimental import pallas as pl
from jax.experimental.pallas import tpu as pltpu


# ----------------------------- Pallas kernel --------------------------------


def _mlp_kernel(x_ref, w3_ref, wd_ref, o_ref, acc_ref):
    # Grid: (token tiles i, ffn tiles j).  j is the reduction axis (last).
    j = pl.program_id(1)
    tf = w3_ref.shape[1] // 3

    x = x_ref[...]                                                   # (tm, H)

    # One fused projection onto this ffn tile: [g1 | g2 | u], f32 accumulation.
    gu = jnp.dot(x, w3_ref[...], preferred_element_type=jnp.float32)  # (tm, 3tf)
    g1 = gu[:, :tf]
    g2 = gu[:, tf:2 * tf]
    u = gu[:, 2 * tf:]

    # SwiGLU gate in f32 on the VPU/EUP: g1 * silu(g2) * u.
    h = g1 * (g2 * jax.nn.sigmoid(g2)) * u                           # (tm, tf) f32

    # Partial down projection for this ffn tile (bf16 MXU operands when the
    # weights are bf16, f32 accumulation).
    part = jnp.dot(h.astype(wd_ref.dtype), wd_ref[...],
                   preferred_element_type=jnp.float32)               # (tm, H)

    @pl.when(j == 0)
    def _():
        acc_ref[...] = part          # direct write, no zero-init pass

    @pl.when(j > 0)
    def _():
        acc_ref[...] += part

    @pl.when(j == pl.num_programs(1) - 1)
    def _():
        o_ref[...] = acc_ref[...].astype(o_ref.dtype)


# ------------------------- tiling / weight preparation ----------------------


def _pick_tile(total, target, quantum):
    """Largest multiple of `quantum` dividing `total` and <= target, else `total`."""
    t = min(target, total)
    t = (t // quantum) * quantum
    while t >= quantum and total % t != 0:
        t -= quantum
    return t if t >= quantum else total


def _device_defaults():
    """(tm_target, tf_target, vmem_limit_bytes) per TPU generation."""
    kind = ""
    try:
        kind = jax.devices()[0].device_kind.lower()
    except Exception:  # pragma: no cover - defensive, never fatal
        pass
    if "v7" in kind:      # 64 MiB physical VMEM, 2 TCs, knee ~620 flops/byte
        return 512, 256, 48 * 2**20
    if "v6" in kind:      # 128 MiB physical VMEM, knee ~680 flops/byte
        return 768, 512, 100 * 2**20
    if "v5" in kind:      # knee ~240 flops/byte, small default scoped VMEM
        return 256, 256, 96 * 2**20
    return 512, 256, 64 * 2**20


def choose_openmoe_mlp_tiles(M, F, tm=None, tf=None):
    tm_t, tf_t, vmem = _device_defaults()
    tm = tm_t if tm is None else tm
    tf = tf_t if tf is None else tf
    tm = _pick_tile(M, tm, 8)
    tf = _pick_tile(F, tf, 128)
    # Prefer >= 2 token tiles so the "parallel" axis can shard across both
    # TensorCores on v7x (and megacore on v5p-like parts).
    if M // tm < 2:
        cand = _pick_tile(M, max(tm // 2, 8), 8)
        if cand < tm and M // cand >= 2:
            tm = cand
    return tm, tf, vmem


def prepare_openmoe_mlp_weights(wg, wu, wd, *, tf, dtype=jnp.bfloat16):
    """Fuse [gate1 | gate2 | up] per ffn-tile into one (H, 3F) weight.

    Run ONCE at weight-load time (outside any jitted step function): under jit
    these reshapes/casts would otherwise materialize fresh HBM copies per call.
    """
    H, F2 = wg.shape
    F = F2 // 2
    assert wu.shape == (H, F), (wu.shape, H, F)
    assert wd.shape == (F, H), (wd.shape, F, H)
    assert F % tf == 0, (F, tf)
    n = F // tf
    wg1, wg2 = wg[:, :F], wg[:, F:]
    parts = [w.reshape(H, n, 1, tf) for w in (wg1, wg2, wu)]
    # Column layout of w3: for each ffn tile j, [g1_j (tf) | g2_j (tf) | u_j (tf)].
    w3 = jnp.concatenate(parts, axis=2).reshape(H, 3 * F).astype(dtype)
    return w3, wd.astype(dtype)


# ------------------------------- pallas wrapper ------------------------------


def openmoe_mlp_fused(x, w3, wd, *, tm, tf, vmem_limit_bytes=None):
    """HFOpenMoeMLP forward with pre-fused weights.

    x : (B, S, H)
    w3: (H, 3F)  per-tile interleaved [gate1 | gate2 | up] (see prepare_*)
    wd: (F, H)   down_proj weight, pre-transposed
    """
    B, S, H = x.shape
    F = w3.shape[1] // 3
    assert w3.shape[0] == H
    assert wd.shape == (F, H)

    M = B * S
    assert M % tm == 0, (M, tm)
    assert F % tf == 0, (F, tf)

    out_dtype = x.dtype
    x2d = x.reshape(M, H).astype(w3.dtype)   # bf16 operands when weights are bf16

    out2d = pl.pallas_call(
        _mlp_kernel,
        out_shape=jax.ShapeDtypeStruct((M, H), out_dtype),
        grid_spec=pltpu.PrefetchScalarGridSpec(
            num_scalar_prefetch=0,
            grid=(M // tm, F // tf),
            in_specs=[
                pl.BlockSpec((tm, H), lambda i, j: (i, 0)),       # x tile
                pl.BlockSpec((H, 3 * tf), lambda i, j: (0, j)),   # fused gate/up
                pl.BlockSpec((tf, H), lambda i, j: (j, 0)),       # down
            ],
            out_specs=pl.BlockSpec((tm, H), lambda i, j: (i, 0)),
            scratch_shapes=[pltpu.VMEM((tm, H), jnp.float32)],
        ),
        compiler_params=pltpu.CompilerParams(
            dimension_semantics=("parallel", "arbitrary"),
            vmem_limit_bytes=vmem_limit_bytes),
    )(x2d, w3, wd)

    return out2d.reshape(B, S, H)


def openmoe_mlp(x, wg, wu, wd, *, tm=None, tf=None, compute_dtype=jnp.bfloat16):
    """Convenience wrapper: tile selection + weight fusion + kernel call.

    In a jitted training / inference step, call choose_openmoe_mlp_tiles and
    prepare_openmoe_mlp_weights once at setup time and use openmoe_mlp_fused.
    """
    B, S, H = x.shape
    F = wu.shape[1]
    tm, tf, vmem = choose_openmoe_mlp_tiles(B * S, F, tm, tf)
    w3, wd_c = prepare_openmoe_mlp_weights(wg, wu, wd, tf=tf, dtype=compute_dtype)
    return openmoe_mlp_fused(x, w3, wd_c, tm=tm, tf=tf, vmem_limit_bytes=vmem)


# ----------------------- pure-JAX reference (for checking) ------------------


def _ref_mlp(x, wg, wu, wd):
    F = wu.shape[1]
    g = x @ wg
    g1, g2 = g[..., :F], g[..., F:]
    return (g1 * (g2 * jax.nn.sigmoid(g2)) * (x @ wu)) @ wd


# ------------------------------------ main -----------------------------------


if __name__ == "__main__":
    # Small config consistent with HFOpenMoeConfig fields used by the module.
    B, S = 2, 16
    hidden_size = 128
    intermediate_size = 256   # ffn_dim

    key = jax.random.PRNGKey(0)
    kx, kg, ku, kd = jax.random.split(key, 4)

    x = jax.random.normal(kx, (B, S, hidden_size), dtype=jnp.float32)
    # nn.Linear(in, out, bias=False).weight has shape (out, in); we store W.T.
    wg = 0.1 * jax.random.normal(
        kg, (hidden_size, 2 * intermediate_size), dtype=jnp.float32)
    wu = 0.1 * jax.random.normal(
        ku, (hidden_size, intermediate_size), dtype=jnp.float32)
    wd = 0.1 * jax.random.normal(
        kd, (intermediate_size, hidden_size), dtype=jnp.float32)

    ref = jax.block_until_ready(_ref_mlp(x, wg, wu, wd))

    # Full-precision path: exact functional check.
    out_f32 = jax.block_until_ready(
        openmoe_mlp(x, wg, wu, wd, compute_dtype=jnp.float32))
    assert out_f32.shape == (B, S, hidden_size)
    assert jnp.allclose(out_f32, ref, rtol=1e-3, atol=1e-3)

    # Production path: bf16 MXU operands, f32 accumulation.
    out_bf16 = jax.block_until_ready(openmoe_mlp(x, wg, wu, wd))
    assert out_bf16.shape == (B, S, hidden_size)
    assert jnp.allclose(out_bf16.astype(jnp.float32), ref, rtol=5e-2, atol=5e-2)

    print("KERNEL_OK")
</pallas_src>

<mosaic_0001>
module attributes {stable_mosaic.version = 11 : i64} {
  func.func @_mlp_kernel(%arg0: i32, %arg1: i32, %arg2: memref<16x128xf32, #tpu.memory_space<vmem>>, %arg3: memref<128x768xf32, #tpu.memory_space<vmem>>, %arg4: memref<256x128xf32, #tpu.memory_space<vmem>>, %arg5: memref<16x128xf32, #tpu.memory_space<vmem>>, %arg6: memref<16x128xf32, #tpu.memory_space<vmem>>) attributes {dimension_semantics = [#tpu.dimension_semantics<parallel>, #tpu.dimension_semantics<arbitrary>], iteration_bounds = array<i64: 2, 1>, scalar_prefetch = 0 : i64, scratch_operands = 1 : i64, tpu.core_type = #tpu.core_type<tc>, window_params = [{transform_indices = @transform_0, window_bounds = array<i64: 16, 128>}, {transform_indices = @transform_1, window_bounds = array<i64: 128, 768>}, {transform_indices = @transform_2, window_bounds = array<i64: 256, 128>}, {transform_indices = @transform_3, window_bounds = array<i64: 16, 128>}]} {
    %c0 = arith.constant 0 : index
    %c0_0 = arith.constant 0 : index
    %0 = vector.load %arg2[%c0, %c0_0] : memref<16x128xf32, #tpu.memory_space<vmem>>, vector<16x128xf32>
    %c0_1 = arith.constant 0 : index
    %c0_2 = arith.constant 0 : index
    %1 = vector.load %arg3[%c0_1, %c0_2] : memref<128x768xf32, #tpu.memory_space<vmem>>, vector<128x768xf32>
    %cst = arith.constant dense<0.000000e+00> : vector<16x768xf32>
    %2 = tpu.matmul %0, %1, %cst {dimension_numbers = #tpu.dot_dimension_numbers<[1], [0], [0], [1], [0, 0, 1, 1], [], []>} : vector<16x128xf32>, vector<128x768xf32>, vector<16x768xf32> -> vector<16x768xf32>
    %3 = vector.extract_strided_slice %2 {offsets = [0, 0], sizes = [16, 256], strides = [1, 1]} : vector<16x768xf32> to vector<16x256xf32>
    %4 = vector.extract_strided_slice %2 {offsets = [0, 256], sizes = [16, 256], strides = [1, 1]} : vector<16x768xf32> to vector<16x256xf32>
    %5 = vector.extract_strided_slice %2 {offsets = [0, 512], sizes = [16, 256], strides = [1, 1]} : vector<16x768xf32> to vector<16x256xf32>
    %6 = arith.negf %4 : vector<16x256xf32>
    %7 = math.exp %6 : vector<16x256xf32>
    %cst_3 = arith.constant 1.000000e+00 : f32
    %8 = vector.broadcast %cst_3 : f32 to vector<16x256xf32>
    %9 = arith.addf %8, %7 : vector<16x256xf32>
    %10 = arith.divf %8, %9 : vector<16x256xf32>
    %11 = arith.mulf %4, %10 : vector<16x256xf32>
    %12 = arith.mulf %3, %11 : vector<16x256xf32>
    %13 = arith.mulf %12, %5 : vector<16x256xf32>
    %c0_4 = arith.constant 0 : index
    %c0_5 = arith.constant 0 : index
    %14 = vector.load %arg4[%c0_4, %c0_5] : memref<256x128xf32, #tpu.memory_space<vmem>>, vector<256x128xf32>
    %cst_6 = arith.constant dense<0.000000e+00> : vector<16x128xf32>
    %15 = tpu.matmul %13, %14, %cst_6 {dimension_numbers = #tpu.dot_dimension_numbers<[1], [0], [0], [1], [0, 0, 1, 1], [], []>} : vector<16x256xf32>, vector<256x128xf32>, vector<16x128xf32> -> vector<16x128xf32>
    %c0_i32 = arith.constant 0 : i32
    %16 = arith.cmpi eq, %arg1, %c0_i32 : i32
    %17 = arith.extui %16 : i1 to i32
    %c0_i32_7 = arith.constant 0 : i32
    %18 = arith.cmpi ne, %17, %c0_i32_7 : i32
    scf.if %18 {
      %c0_12 = arith.constant 0 : index
      %c0_13 = arith.constant 0 : index
      %25 = vector.load %arg6[%c0_12, %c0_13] : memref<16x128xf32, #tpu.memory_space<vmem>>, vector<16x128xf32>
      tpu.vector_store %arg6[%c0_12, %c0_13], %15 {strides = array<i32>} : memref<16x128xf32, #tpu.memory_space<vmem>>, vector<16x128xf32>,
    } else {
    }
    %c0_i32_8 = arith.constant 0 : i32
    %19 = arith.cmpi sgt, %arg1, %c0_i32_8 : i32
    %20 = arith.extui %19 : i1 to i32
    %c0_i32_9 = arith.constant 0 : i32
    %21 = arith.cmpi ne, %20, %c0_i32_9 : i32
    scf.if %21 {
      %c0_12 = arith.constant 0 : index
      %c0_13 = arith.constant 0 : index
      %25 = vector.load %arg6[%c0_12, %c0_13] : memref<16x128xf32, #tpu.memory_space<vmem>>, vector<16x128xf32>
      %26 = arith.addf %25, %15 : vector<16x128xf32>
      %c0_14 = arith.constant 0 : index
      %c0_15 = arith.constant 0 : index
      %27 = vector.load %arg6[%c0_14, %c0_15] : memref<16x128xf32, #tpu.memory_space<vmem>>, vector<16x128xf32>
      tpu.vector_store %arg6[%c0_14, %c0_15], %26 {strides = array<i32>} : memref<16x128xf32, #tpu.memory_space<vmem>>, vector<16x128xf32>,
    } else {
    }
    %c0_i32_10 = arith.constant 0 : i32
    %22 = arith.cmpi eq, %arg1, %c0_i32_10 : i32
    %23 = arith.extui %22 : i1 to i32
    %c0_i32_11 = arith.constant 0 : i32
    %24 = arith.cmpi ne, %23, %c0_i32_11 : i32
    scf.if %24 {
      %c0_12 = arith.constant 0 : index
      %c0_13 = arith.constant 0 : index
      %25 = vector.load %arg6[%c0_12, %c0_13] : memref<16x128xf32, #tpu.memory_space<vmem>>, vector<16x128xf32>
      %c0_14 = arith.constant 0 : index
      %c0_15 = arith.constant 0 : index
      %26 = vector.load %arg5[%c0_14, %c0_15] : memref<16x128xf32, #tpu.memory_space<vmem>>, vector<16x128xf32>
      tpu.vector_store %arg5[%c0_14, %c0_15], %25 {strides = array<i32>} : memref<16x128xf32, #tpu.memory_space<vmem>>, vector<16x128xf32>,
    } else {
    }
    return
  }
  func.func @transform_0(%arg0: i32, %arg1: i32) -> (i32, i32) {
    %c0_i32 = arith.constant 0 : i32
    %c0_i32_0 = arith.constant 0 : i32
    return %arg0, %c0_i32 : i32, i32
  }
  func.func @transform_1(%arg0: i32, %arg1: i32) -> (i32, i32) {
    %c0_i32 = arith.constant 0 : i32
    %c0_i32_0 = arith.constant 0 : i32
    return %c0_i32, %arg1 : i32, i32
  }
  func.func @transform_2(%arg0: i32, %arg1: i32) -> (i32, i32) {
    %c0_i32 = arith.constant 0 : i32
    %c0_i32_0 = arith.constant 0 : i32
    return %arg1, %c0_i32 : i32, i32
  }
  func.func @transform_3(%arg0: i32, %arg1: i32) -> (i32, i32) {
    %c0_i32 = arith.constant 0 : i32
    %c0_i32_0 = arith.constant 0 : i32
    return %arg0, %c0_i32 : i32, i32
  }
}

</mosaic_0001>

<bundles_post_ra>
// kernel: tpu_custom_call.1
= control target key start
LH: loop header
LB: loop body
LE: loop exit
PB: predicated region body
PF: predicated region fallthrough
CT: control target
= control target key end

     0   :  { %8 = vsyncpa [#allocation4], 0  ;;  %s1645_s0 = inlined_call_operand.hbm [shape: f32[32,128], index: 0, kind: input, shape index: {}]   ;;  %s1646_s1 = inlined_call_operand.hbm [shape: f32[128,768], index: 1, kind: input, shape index: {}]   ;;  %s1647_s2 = inlined_call_operand.hbm [shape: f32[256,128], index: 2, kind: input, shape index: {}]   ;;  %s1648_s3 = inlined_call_operand.hbm [shape: f32[32,128], index: 3, kind: output, shape index: {}]  }
   0x1   :  { %10 = vsyncpa [#allocation4 + $0x1], 0 }
   0x2   :  { %11 = vsyncpa [#allocation7], 0 }
   0x3   :  { %12 = vsyncpa [#allocation5], 0 }
   0x4   :  { %14 = vsyncpa [#allocation5 + $0x1], 0  ;;  %s1365_s12 = smov 0   ;;  %s1367_s13 = smov 0  }
   0x5   :  { %s1369_s14 = smov 0   ;;  %s1371_s15 = smov 0  }
   0x6   :  { %s1373_s16 = smov 0   ;;  %s1375_s17 = smov 0  }
   0x7 LB: > { %s863_s18 = sadd.s32 4294967295, %s1332_s17   ;;  %s864_s19 = sadd.s32 4294967294, %s1332_s17   ;;  %s1332_s17 = sphi %s1375_s17, %s20_s17   ;;  %s1328_s16 = sphi %s1373_s16, %s1670_s16   ;;  %s1324_s15 = sphi %s1371_s15, %s1669_s15   ;;  %s1320_s14 = sphi %s1369_s14, %s1668_s14   ;;  %s1316_s13 = sphi %s1367_s13, %s1667_s13   ;;  %s1312_s12 = sphi %s1365_s12, %s1666_s12  }
   0x8   : > { %p52_p0 = scmp.ne.s32.totalorder %s1316_s13, %s1312_s12  ;;  %p1399_p1 = scmp.eq.s32.totalorder %s863_s18, 0 }
   0x9   : > { %p1403_p2 = scmp.eq.s32.totalorder %s863_s18, 1  ;;  %p134_p3 = scmp.eq.s32.totalorder %s864_s19, 1 }
   0xa   : > { %s1653_s20 = scalar_select %p1399_p1, 1, 0 }
   0xb   : > { %p1409_p4 = por %p1399_p1, %p52_p0  ;;  %p865_p5 = scmp.ge.s32.totalorder %s1332_s17, 1 }
   0xc   : > { %p1414_p6 = por %p134_p3, %p52_p0  ;;  %p141_p7 = scmp.lt.s32.totalorder %s1332_s17, 3 }
   0xd   : > { %s1655_s22 = scalar_select %p1409_p4, 1, 0 }
   0xe   : > { %s1656_s23 = scalar_select %p1414_p6, 1, 0 }
   0xf   : > { %p1419_p8 = pnand %p865_p5, %p141_p7  ;;  %s1334_s25 = smov [#allocation6]  }
  0x10   : > { %s156_s26 = sshll.u32 %s1334_s25, 4  ;;  %s1335_s28 = smov [#allocation8]   ;;  %s1423_s26 = int_to_ptr.vmem [resolvable:$true] %s156_s26 }
  0x11   : > { %p1066_p9 = pneg %p1419_p8  ;;  %s172_s29 = sshll.u32 %s1335_s28, 4  ;;  %s1434_s29 = int_to_ptr.vmem [resolvable:$true] %s172_s29 }
  0x12   : > { %s1160_s5 = scalar_lea.hbm %s1646_s1, 12288 }
  0x13   : > { %p1430_p11 = pnand %p1066_p9, %p1399_p1  ;;  %p1161_p12 = scmp.ne.s32.totalorder %s1646_s1, %s1160_s5 }
  0x14   : > { %p1167_p5 = scmp.lt.u32.totalorder %s1160_s5, %s1646_s1 }
  0x15   : > { %p1162_p13 = pneg %p1430_p11 }
  0x17   : > { %p1163_p0 = pnand %p1162_p13, %p1161_p12 }
  0x19   : > { %p1164_p3 = pneg %p1163_p0 }
  0x1b   : > { %p1169_p7 = pnand %p1167_p5, %p1164_p3 }
  0x1d   : > { %1172 = shalt.err (!%p1169_p7)
}
  0x1e   : > { %s1173_s10 = scalar_lea.vmem %s1423_s26, 12288  ;;  %p1181_p1 = scmp.lt.s32.totalorder %s1423_s26, %s1423_s26 }
  0x1f   : > { %p1174_p9 = scmp.ne.s32.totalorder %s1423_s26, %s1173_s10  ;;  %p1182_p12 = scmp.lt.s32.totalorder %s1173_s10, %s1173_s10 }
  0x21   : > { %p1176_p10 = pnand %p1174_p9, %p1162_p13  ;;  %p1183_p0 = por %p1182_p12, %p1181_p1 }
  0x23   : > { %p1177_p6 = pneg %p1176_p10 }
  0x25   : > { %p1184_p4 = pnand %p1183_p0, %p1177_p6 }
  0x27   : > { %1187 = shalt.err (!%p1184_p4)
}
  0x28   : > { %s1336_s11 = smov 768   ;;  %s1337_s18 = smov 48  }
  0x29   : > { %1069 = dma.hbm_to_vmem [thread:$0]  (!%p1430_p11), %s1646_s1, 12288, %s1423_s26, [#allocation7], %s1336_s11, %s1336_s11, %s1337_s18  }
  0x2a   : > { %s1188_s4 = scalar_lea.hbm %s1647_s2, 4096 }
  0x2b   : > { %p1189_p1 = scmp.ne.s32.totalorder %s1647_s2, %s1188_s4  ;;  %p1195_p10 = scmp.lt.u32.totalorder %s1188_s4, %s1647_s2 }
  0x2d   : > { %p1191_p4 = pnand %p1189_p1, %p1162_p13 }
  0x2f   : > { %p1192_p6 = pneg %p1191_p4 }
  0x31   : > { %p1197_p3 = pnand %p1195_p10, %p1192_p6 }
  0x33   : > { %1200 = shalt.err (!%p1197_p3)
}
  0x34   : > { %s1201_s26 = scalar_lea.vmem %s1434_s29, 4096  ;;  %p1209_p12 = scmp.lt.s32.totalorder %s1434_s29, %s1434_s29 }
  0x35   : > { %p1202_p5 = scmp.ne.s32.totalorder %s1434_s29, %s1201_s26  ;;  %p1210_p0 = scmp.lt.s32.totalorder %s1201_s26, %s1201_s26 }
  0x37   : > { %p1204_p7 = pnand %p1202_p5, %p1162_p13  ;;  %p1211_p1 = por %p1210_p0, %p1209_p12 }
  0x39   : > { %p1205_p9 = pneg %p1204_p7 }
  0x3b   : > { %p1212_p4 = pnand %p1211_p1, %p1205_p9 }
  0x3d   : > { %1215 = shalt.err (!%p1212_p4)
}
  0x3e   : > { %s1338_s9 = smov 128   ;;  %s1339_s10 = smov 8  }
  0x3f   : > { %1072 = dma.hbm_to_vmem [thread:$0]  (!%p1430_p11), %s1647_s2, 4096, %s1434_s29, [#allocation7], %s1338_s9, %s1338_s9, %s1339_s10  }
  0x40   : > { %s32_s19 = sadd.s32 1, %s1328_s16  ;;  %s39_s25 = sadd.s32 1, %s1320_s14 }
  0x41   : > { %p34_p13 = scmp.ge.s32.totalorder %s32_s19, 2  ;;  %p46_p6 = scmp.ne.s32.totalorder %s1320_s14, %s1316_s13 }
  0x42   : > { %p47_p10 = scmp.eq.s32.totalorder %s1332_s17, 0  ;;  %p1083_p3 = scmp.lt.s32.totalorder %s1332_s17, 2 }
  0x43   : > { %s1672_s19 = smov (%p34_p13, %s32_s19), 0  ;;  %p1501_p7 = por %p1403_p2, %p46_p6 }
  0x44   : > { %p48_p5 = por %p47_p10, %p46_p6  ;;  %s36_s28 = ssub.s32 %s1328_s16, %s1672_s19 }
  0x45   : > { %s1659_s27 = scalar_select %p1501_p7, 1, 0 }
  0x46   : > { %s186_s30 = sand.u32 1, %s1320_s14   ;;  %p37_p9 = scmp.eq.s32.totalorder %s36_s28, 0 }
  0x47   : > { %s869_s29 = sshll.u32 %s186_s30, 4  ;;  %s886_s4 = sshll.u32 %s1328_s16, 8 }
  0x48   : > { %s1510_s5 = scalar_select %p37_p9, %s1320_s14, %s39_s25  }
  0x49   : > { %s1515_s8 = scalar_lea.hbm %s1645_s0, %s886_s4  ;;  %s190_s21 = scalar_lea.vmem [#allocation3], %s869_s29 }
  0x4a   : > { %s197_s26 = sshll.u32 %s190_s21, 4  ;;  %p1519_p2 = pnand %p1083_p3, %p48_p5  ;;  %s1523_s26 = int_to_ptr.vmem [resolvable:$true] %s197_s26 }
  0x4b   : > { %s1525_s18 = scalar_lea.sflag [#allocation4], %s186_s30  ;;  %s1216_s25 = scalar_lea.hbm %s1515_s8, 256 }
  0x4c   : > { %p1217_p11 = scmp.ne.s32.totalorder %s1515_s8, %s1216_s25  ;;  %p1218_p12 = pneg %p1519_p2 }
  0x4d   : > { %s1221_s4 = scalar_lea.hbm %s1645_s0, 512  ;;  %p1222_p4 = scmp.lt.u32.totalorder %s1515_s8, %s1645_s0 }
  0x4e   : > { %p1219_p0 = pnand %p1218_p12, %p1217_p11  ;;  %p1223_p13 = scmp.lt.u32.totalorder %s1221_s4, %s1216_s25 }
  0x4f   : > { %p1225_p10 = scmp.lt.u32.totalorder %s1216_s25, %s1515_s8 }
  0x50   : > { %p1220_p1 = pneg %p1219_p0  ;;  %p1224_p6 = por %p1223_p13, %p1222_p4 }
  0x52   : > { %p1226_p3 = por %p1225_p10, %p1224_p6 }
  0x54   : > { %p1227_p5 = pnand %p1226_p3, %p1220_p1 }
  0x56   : > { %1230 = shalt.err (!%p1227_p5)
}
  0x57   : > { %s1231_s30 = scalar_lea.vmem %s1523_s26, 256  ;;  %s1340_s21 = smov [#allocation3]  }
  0x58   : > { %p1232_p9 = scmp.ne.s32.totalorder %s1523_s26, %s1231_s30  ;;  %s1236_s28 = sshll.u32 %s1340_s21, 4  ;;  %s1237_s28 = int_to_ptr.vmem [resolvable:$false] %s1236_s28 }
  0x59   : > { %s1238_s29 = scalar_lea.vmem %s1237_s28, 512  ;;  %p1239_p7 = scmp.lt.s32.totalorder %s1523_s26, %s1237_s28 }
  0x5a   : > { %p1234_p11 = pnand %p1232_p9, %p1218_p12  ;;  %p1240_p4 = scmp.lt.s32.totalorder %s1238_s29, %s1231_s30 }
  0x5c   : > { %p1235_p0 = pneg %p1234_p11  ;;  %p1241_p13 = por %p1240_p4, %p1239_p7 }
  0x5e   : > { %p1242_p6 = pnand %p1241_p13, %p1235_p0 }
  0x60   : > { %1245 = shalt.err (!%p1242_p6)
}
  0x61   : > { %1076 = dma.hbm_to_vmem [thread:$0]  (!%p1519_p2), %s1515_s8, 256, %s1523_s26, %s1525_s18, %s1338_s9, %s1338_s9, %s1339_s10  }
  0x62   : > { %209 = sbr.rel (%p1419_p8) target bundleno = 627 (0x273), region = 32  ;;  %s1559_s25 = sand.u32 (!%p1419_p8), 1, %s1316_s13  }
  0x63   : > { %s873_s4 = sshll.u32 (!%p1419_p8), %s1559_s25, 4  ;;  %s212_s6 = scalar_lea.sflag (!%p1419_p8), [#allocation4], %s1559_s25 }
  0x64   : > { %s1565_s11 = scalar_lea.vmem (!%p1419_p8), [#allocation3], %s873_s4  ;;  %p1661_p7 = scmp.ne.s32.totalorder (!%p1419_p8), %s1655_s22, 0 }
  0x69   : > { %1299 = dma.done.wait (%p1661_p7), %s212_s6, 256  }
  0x6a   : > { %1301 = vsyncadd (%p1661_p7), %s212_s6, 4294967040  ;;  %p1662_p2 = scmp.ne.s32.totalorder %s1653_s20, 0 }
  0x6c   : > { %1303 = dma.done.wait (%p1662_p2), [#allocation7], 16384  }
  0x6d   : > { %1305 = vsyncadd (%p1662_p2), [#allocation7], 4294950912  ;;  %v1341_v0 = vmov 0.0   ;;  %v253_v1 = vld [vmem:[#allocation6 + $0x8] sm:$0xff]  ;;  %v259_v2 = vld [vmem:[#allocation6 + $0x38] sm:$0xff]  ;;  %s245_s20 = scalar_lea.vmem [#allocation9], %s873_s4 }
  0x6e   : > { %412 = vmatprep.mubr.f32.mxu0 %v1341_v0  ;;  %489 = vmatprep.mubr.f32.mxu1 %v1341_v0  ;;  %v255_v3 = vld [vmem:[#allocation6 + $0x18] sm:$0xff]  ;;  %v926_v4 = vpack.c.bf16 %v259_v2, %v253_v1  ;;  %v261_v5 = vld [vmem:[#allocation6 + $0x48] sm:$0xff]  ;;  %v252_v6 = vld [vmem:[#allocation6] sm:$0xff]  ;;  %s759_s22 = sshll.u32 %s245_s20, 4  ;;  %s887_s24 = sshll.u32 %s1324_s15, 8  ;;  %s1591_s22 = int_to_ptr.vmem [resolvable:$true] %s759_s22 }
  0x6f   : > { %v258_v7 = vld [vmem:[#allocation6 + $0x30] sm:$0xff]  ;;  %v958_v8 = vpack.c.bf16 %v261_v5, %v255_v3  ;;  %v260_v11 = vld [vmem:[#allocation6 + $0x40] sm:$0xff]  ;;  %v265_v12 = vld [vmem:[#allocation6 + $0x68] sm:$0xff]  ;;  %s1596_s8 = scalar_lea.hbm %s1648_s3, %s887_s24  ;;  %s746_s26 = scalar_lea.sflag [#allocation5], %s1559_s25 }
  0x70   : > { %v928_v9 = vpack.c.bf16 %v258_v7, %v252_v6  ;;  %v254_v10 = vld [vmem:[#allocation6 + $0x10] sm:$0xff]  ;;  %927 = vmatprep.subr.bf16.mxu0 %v926_v4  ;;  %v271_v14 = vld [vmem:[#allocation6 + $0x98] sm:$0xff]  ;;  %v273_v16 = vld [vmem:[#allocation6 + $0xa8] sm:$0xff]  ;;  %s1246_s18 = scalar_lea.vmem %s1591_s22, 256  ;;  %p1663_p12 = scmp.ne.s32.totalorder %s1659_s27, 0 }
  0x71   : > { %v960_v13 = vpack.c.bf16 %v260_v11, %v254_v10  ;;  %v267_v15 = vld [vmem:[#allocation6 + $0x78] sm:$0xff]  ;;  %959 = vmatprep.subr.bf16.mxu1 %v958_v8  ;;  %v930_v17 = vpack.c.bf16 %v271_v14, %v265_v12  ;;  %v264_v19 = vld [vmem:[#allocation6 + $0x60] sm:$0xff]  ;;  %v270_v20 = vld [vmem:[#allocation6 + $0x90] sm:$0xff]  ;;  %p1247_p8 = scmp.ne.s32.totalorder %s1591_s22, %s1246_s18  ;;  %s1342_s15 = smov [#allocation9]  }
  0x72   : > { %929 = vmatpush1.bf16.msra.mxu0 %v928_v9  ;;  %v962_v18 = vpack.c.bf16 %v273_v16, %v267_v15  ;;  %v266_v21 = vld [vmem:[#allocation6 + $0x70] sm:$0xff]  ;;  %v932_v22 = vpack.c.bf16 %v270_v20, %v264_v19  ;;  %v272_v23 = vld [vmem:[#allocation6 + $0xa0] sm:$0xff]  ;;  %v277_v24 = vld [vmem:[#allocation6 + $0xc8] sm:$0xff]  ;;  %s1250_s7 = sshll.u32 %s1342_s15, 4  ;;  %s1251_s7 = int_to_ptr.vmem [resolvable:$false] %s1250_s7 }
  0x73   : > { %961 = vmatpush1.bf16.msra.mxu1 %v960_v13  ;;  %v283_v25 = vld [vmem:[#allocation6 + $0xf8] sm:$0xff]  ;;  %931 = vmatprep.subr.bf16.mxu0 %v930_v17  ;;  %v964_v26 = vpack.c.bf16 %v272_v23, %v266_v21  ;;  %v285_v29 = vld [vmem:[#allocation6 + $0x108] sm:$0xff]  ;;  %v276_v30 = vld [vmem:[#allocation6 + $0xc0] sm:$0xff]  ;;  %p1248_p1 = pnand %p1247_p8, %p1663_p12  ;;  %s1252_s30 = scalar_lea.vmem %s1251_s7, 512 }
  0x74   : > { %963 = vmatprep.subr.bf16.mxu1 %v962_v18  ;;  %v934_v27 = vpack.c.bf16 %v283_v25, %v277_v24  ;;  %v279_v28 = vld [vmem:[#allocation6 + $0xd8] sm:$0xff]  ;;  %v282_v32 = vld [vmem:[#allocation6 + $0xf0] sm:$0xff]  ;;  %v284_v34 = vld [vmem:[#allocation6 + $0x100] sm:$0xff]  ;;  %p1253_p3 = scmp.lt.s32.totalorder %s1591_s22, %s1251_s7  ;;  %p1254_p5 = scmp.lt.s32.totalorder %s1252_s30, %s1246_s18 }
  0x75   : > { %v966_v31 = vpack.c.bf16 %v285_v29, %v279_v28  ;;  %v278_v33 = vld [vmem:[#allocation6 + $0xd0] sm:$0xff]  ;;  %v936_v35 = vpack.c.bf16 %v282_v32, %v276_v30  ;;  %v289_v36 = vld [vmem:[#allocation6 + $0x128] sm:$0xff]  ;;  %v295_v37 = vld [vmem:[#allocation6 + $0x158] sm:$0xff]  ;;  %p1249_p10 = pneg %p1248_p1 }
  0x76   : > { %933 = vmatpush1.bf16.msra.mxu0 %v932_v22  ;;  %v291_v38 = vld [vmem:[#allocation6 + $0x138] sm:$0xff]  ;;  %v968_v39 = vpack.c.bf16 %v284_v34, %v278_v33  ;;  %v938_v40 = vpack.c.bf16 %v295_v37, %v289_v36  ;;  %v297_v41 = vld [vmem:[#allocation6 + $0x168] sm:$0xff]  ;;  %v288_v42 = vld [vmem:[#allocation6 + $0x120] sm:$0xff]  ;;  %p1255_p9 = por %p1254_p5, %p1253_p3 }
  0x77   : > { %965 = vmatpush1.bf16.msra.mxu1 %v964_v26  ;;  %935 = vmatprep.subr.bf16.mxu0 %v934_v27  ;;  %v294_v43 = vld [vmem:[#allocation6 + $0x150] sm:$0xff]  ;;  %v970_v44 = vpack.c.bf16 %v297_v41, %v291_v38  ;;  %v296_v46 = vld [vmem:[#allocation6 + $0x160] sm:$0xff]  ;;  %v301_v47 = vld [vmem:[#allocation6 + $0x188] sm:$0xff] }
  0x78   : > { %967 = vmatprep.subr.bf16.mxu1 %v966_v31  ;;  %v290_v45 = vld [vmem:[#allocation6 + $0x130] sm:$0xff]  ;;  %v307_v48 = vld [vmem:[#allocation6 + $0x1b8] sm:$0xff]  ;;  %v309_v50 = vld [vmem:[#allocation6 + $0x1c8] sm:$0xff]  ;;  %v940_v51 = vpack.c.bf16 %v294_v43, %v288_v42  ;;  %p1256_p11 = pnand %p1255_p9, %p1249_p10 }
  0x79   : > { %v303_v49 = vld [vmem:[#allocation6 + $0x198] sm:$0xff]  ;;  %v972_v52 = vpack.c.bf16 %v296_v46, %v290_v45  ;;  %v942_v53 = vpack.c.bf16 %v307_v48, %v301_v47  ;;  %v300_v54 = vld [vmem:[#allocation6 + $0x180] sm:$0xff]  ;;  %v306_v55 = vld [vmem:[#allocation6 + $0x1b0] sm:$0xff] }
  0x7a   : > { %937 = vmatpush1.bf16.msra.mxu0 %v936_v35  ;;  %v302_v56 = vld [vmem:[#allocation6 + $0x190] sm:$0xff]  ;;  %v974_v57 = vpack.c.bf16 %v309_v50, %v303_v49  ;;  %v308_v58 = vld [vmem:[#allocation6 + $0x1c0] sm:$0xff]  ;;  %v313_v59 = vld [vmem:[#allocation6 + $0x1e8] sm:$0xff]  ;;  %v944_v63 = vpack.c.bf16 %v306_v55, %v300_v54 }
  0x7b   : > { %969 = vmatpush1.bf16.msra.mxu1 %v968_v39  ;;  %939 = vmatprep.subr.bf16.mxu0 %v938_v40  ;;  %v319_v60 = vld [vmem:[#allocation6 + $0x218] sm:$0xff]  ;;  %v321_v62 = vld [vmem:[#allocation6 + $0x228] sm:$0xff]  ;;  %v976_v1 = vpack.c.bf16 %v308_v58, %v302_v56  ;;  %v312_v3 = vld [vmem:[#allocation6 + $0x1e0] sm:$0xff] }
  0x7c   : > { %971 = vmatprep.subr.bf16.mxu1 %v970_v44  ;;  %v315_v61 = vld [vmem:[#allocation6 + $0x1f8] sm:$0xff]  ;;  %v946_v2 = vpack.c.bf16 %v319_v60, %v313_v59  ;;  %v318_v4 = vld [vmem:[#allocation6 + $0x210] sm:$0xff]  ;;  %v320_v7 = vld [vmem:[#allocation6 + $0x220] sm:$0xff] }
  0x7d   : > { %v314_v5 = vld [vmem:[#allocation6 + $0x1f0] sm:$0xff]  ;;  %v978_v6 = vpack.c.bf16 %v321_v62, %v315_v61  ;;  %v325_v8 = vld [vmem:[#allocation6 + $0x248] sm:$0xff]  ;;  %v331_v9 = vld [vmem:[#allocation6 + $0x278] sm:$0xff]  ;;  %v948_v12 = vpack.c.bf16 %v318_v4, %v312_v3 }
  0x7e   : > { %941 = vmatpush1.bf16.msra.mxu0 %v940_v51  ;;  %v327_v10 = vld [vmem:[#allocation6 + $0x258] sm:$0xff]  ;;  %v333_v11 = vld [vmem:[#allocation6 + $0x288] sm:$0xff]  ;;  %v980_v13 = vpack.c.bf16 %v320_v7, %v314_v5  ;;  %v950_v14 = vpack.c.bf16 %v331_v9, %v325_v8  ;;  %v324_v15 = vld [vmem:[#allocation6 + $0x240] sm:$0xff] }
  0x7f   : > { %973 = vmatpush1.bf16.msra.mxu1 %v972_v52  ;;  %943 = vmatprep.subr.bf16.mxu0 %v942_v53  ;;  %v330_v16 = vld [vmem:[#allocation6 + $0x270] sm:$0xff]  ;;  %v982_v18 = vpack.c.bf16 %v333_v11, %v327_v10  ;;  %v332_v19 = vld [vmem:[#allocation6 + $0x280] sm:$0xff]  ;;  %v337_v20 = vld [vmem:[#allocation6 + $0x2a8] sm:$0xff] }
  0x80   : > { %975 = vmatprep.subr.bf16.mxu1 %v974_v57  ;;  %v326_v17 = vld [vmem:[#allocation6 + $0x250] sm:$0xff]  ;;  %v343_v21 = vld [vmem:[#allocation6 + $0x2d8] sm:$0xff]  ;;  %v345_v23 = vld [vmem:[#allocation6 + $0x2e8] sm:$0xff]  ;;  %v952_v24 = vpack.c.bf16 %v330_v16, %v324_v15 }
  0x81   : > { %v339_v22 = vld [vmem:[#allocation6 + $0x2b8] sm:$0xff]  ;;  %v984_v25 = vpack.c.bf16 %v332_v19, %v326_v17  ;;  %v954_v26 = vpack.c.bf16 %v343_v21, %v337_v20  ;;  %v336_v27 = vld [vmem:[#allocation6 + $0x2a0] sm:$0xff]  ;;  %v342_v28 = vld [vmem:[#allocation6 + $0x2d0] sm:$0xff] }
  0x82   : > { %945 = vmatpush1.bf16.msra.mxu0 %v944_v63  ;;  %v338_v29 = vld [vmem:[#allocation6 + $0x2b0] sm:$0xff]  ;;  %v986_v30 = vpack.c.bf16 %v345_v23, %v339_v22  ;;  %v344_v31 = vld [vmem:[#allocation6 + $0x2e0] sm:$0xff]  ;;  %v257_v32 = vld [vmem:[#allocation6 + $0x28] sm:$0xff]  ;;  %v956_v34 = vpack.c.bf16 %v342_v28, %v336_v27 }
  0x83   : > { %977 = vmatpush1.bf16.msra.mxu1 %v976_v1  ;;  %947 = vmatprep.subr.bf16.mxu0 %v946_v2  ;;  %v263_v33 = vld [vmem:[#allocation6 + $0x58] sm:$0xff]  ;;  %v988_v35 = vpack.c.bf16 %v344_v31, %v338_v29  ;;  %v256_v37 = vld [vmem:[#allocation6 + $0x20] sm:$0xff]  ;;  %v262_v38 = vld [vmem:[#allocation6 + $0x50] sm:$0xff] }
  0x84   : > { %979 = vmatprep.subr.bf16.mxu1 %v978_v6  ;;  %v990_v36 = vpack.c.bf16 %v263_v33, %v257_v32  ;;  %v269_v39 = vld [vmem:[#allocation6 + $0x88] sm:$0xff]  ;;  %v275_v40 = vld [vmem:[#allocation6 + $0xb8] sm:$0xff]  ;;  %v1578_v41 = vld [vmem:[%s1565_s11] sm:$0xff]  ;;  %v992_v42 = vpack.c.bf16 %v262_v38, %v256_v37 }
  0x85   : > { %v994_v43 = vpack.c.bf16 %v275_v40, %v269_v39  ;;  %v268_v44 = vld [vmem:[#allocation6 + $0x80] sm:$0xff]  ;;  %v274_v45 = vld [vmem:[#allocation6 + $0xb0] sm:$0xff]  ;;  %v281_v46 = vld [vmem:[#allocation6 + $0xe8] sm:$0xff] }
  0x86   : > { %949 = vmatpush1.bf16.msra.mxu0 %v948_v12  ;;  %v287_v47 = vld [vmem:[#allocation6 + $0x118] sm:$0xff]  ;;  %v996_v48 = vpack.c.bf16 %v274_v45, %v268_v44  ;;  %v280_v51 = vld [vmem:[#allocation6 + $0xe0] sm:$0xff]  ;;  %v286_v52 = vld [vmem:[#allocation6 + $0x110] sm:$0xff] }
  0x87   : > { %981 = vmatpush1.bf16.msra.mxu1 %v980_v13  ;;  %951 = vmatprep.subr.bf16.mxu0 %v950_v14  ;;  %v251_v49 = vld [vmem:[%s1565_s11 + $0x8] sm:$0xff]  ;;  %v998_v50 = vpack.c.bf16 %v287_v47, %v281_v46  ;;  %v1000_v55 = vpack.c.bf16 %v286_v52, %v280_v51  ;;  %v292_v57 = vld [vmem:[#allocation6 + $0x140] sm:$0xff]  ;;  %v298_v58 = vld [vmem:[#allocation6 + $0x170] sm:$0xff] }
  0x88   : > { %983 = vmatprep.subr.bf16.mxu1 %v982_v18  ;;  %v293_v53 = vld [vmem:[#allocation6 + $0x148] sm:$0xff]  ;;  %v299_v54 = vld [vmem:[#allocation6 + $0x178] sm:$0xff]  ;;  %v1004_v61 = vpack.c.bf16 %v298_v58, %v292_v57  ;;  %v304_v63 = vld [vmem:[#allocation6 + $0x1a0] sm:$0xff] }
  0x89   : > { %v1002_v56 = vpack.c.bf16 %v299_v54, %v293_v53  ;;  %v305_v59 = vld [vmem:[#allocation6 + $0x1a8] sm:$0xff]  ;;  %v311_v60 = vld [vmem:[#allocation6 + $0x1d8] sm:$0xff]  ;;  %v310_v1 = vld [vmem:[#allocation6 + $0x1d0] sm:$0xff] }
  0x8a   : > { %953 = vmatpush1.bf16.msra.mxu0 %v952_v24  ;;  %v1006_v62 = vpack.c.bf16 %v311_v60, %v305_v59  ;;  %v317_v2 = vld [vmem:[#allocation6 + $0x208] sm:$0xff]  ;;  %v323_v3 = vld [vmem:[#allocation6 + $0x238] sm:$0xff]  ;;  %v1008_v4 = vpack.c.bf16 %v310_v1, %v304_v63  ;;  %v316_v6 = vld [vmem:[#allocation6 + $0x200] sm:$0xff] }
  0x8b   : > { %985 = vmatpush1.bf16.msra.mxu1 %v984_v25  ;;  %955 = vmatprep.subr.bf16.mxu0 %v954_v26  ;;  %v1010_v5 = vpack.c.bf16 %v323_v3, %v317_v2  ;;  %v322_v7 = vld [vmem:[#allocation6 + $0x230] sm:$0xff]  ;;  %v329_v8 = vld [vmem:[#allocation6 + $0x268] sm:$0xff]  ;;  %v335_v9 = vld [vmem:[#allocation6 + $0x298] sm:$0xff] }
  0x8c   : > { %987 = vmatprep.subr.bf16.mxu1 %v986_v30  ;;  %v1012_v10 = vpack.c.bf16 %v322_v7, %v316_v6  ;;  %v1014_v11 = vpack.c.bf16 %v335_v9, %v329_v8  ;;  %v328_v12 = vld [vmem:[#allocation6 + $0x260] sm:$0xff]  ;;  %v334_v13 = vld [vmem:[#allocation6 + $0x290] sm:$0xff]  ;;  %v341_v14 = vld [vmem:[#allocation6 + $0x2c8] sm:$0xff] }
  0x8d   : > { %v347_v15 = vld [vmem:[#allocation6 + $0x2f8] sm:$0xff]  ;;  %v1016_v16 = vpack.c.bf16 %v334_v13, %v328_v12  ;;  %v340_v18 = vld [vmem:[#allocation6 + $0x2c0] sm:$0xff]  ;;  %v346_v19 = vld [vmem:[#allocation6 + $0x2f0] sm:$0xff] }
  0x8e   : > { %957 = vmatpush1.bf16.msra.mxu0 %v956_v34  ;;  %v1018_v17 = vpack.c.bf16 %v347_v15, %v341_v14  ;;  %v1020_v20 = vpack.c.bf16 %v346_v19, %v340_v18  ;;  %v631_v21 = vld [vmem:[#allocation8 + $0x80] sm:$0xff]  ;;  %v632_v22 = vld [vmem:[#allocation8 + $0x88] sm:$0xff]  ;;  %v633_v27 = vld [vmem:[#allocation8 + $0x90] sm:$0xff] }
  0x8f   : > { %989 = vmatpush1.bf16.msra.mxu1 %v988_v35  ;;  %991 = vmatprep.subr.bf16.mxu0 %v990_v36  ;;  %v1022_v23 = vpack.c.bf16 %v632_v22, %v631_v21  ;;  %v615_v24 = vld [vmem:[#allocation8] sm:$0xff]  ;;  %v616_v25 = vld [vmem:[#allocation8 + $0x8] sm:$0xff]  ;;  %v634_v28 = vld [vmem:[#allocation8 + $0x98] sm:$0xff] }
  0x90   : > { %v1024_v26 = vpack.c.bf16 %v616_v25, %v615_v24  ;;  %v1026_v29 = vpack.c.bf16 %v634_v28, %v633_v27  ;;  %v617_v30 = vld [vmem:[#allocation8 + $0x10] sm:$0xff]  ;;  %v618_v31 = vld [vmem:[#allocation8 + $0x18] sm:$0xff]  ;;  %v635_v33 = vld [vmem:[#allocation8 + $0xa0] sm:$0xff] }
  0x91   : > { %413 = vmatmul.mubr.f32.vlgmr.msra.gmra.mrb[0].mxu0 %v1578_v41  ;;  %1023 = vmatprep.subr.bf16.mxu1 %v1022_v23  ;;  %v1028_v32 = vpack.c.bf16 %v618_v31, %v617_v30  ;;  %v636_v34 = vld [vmem:[#allocation8 + $0xa8] sm:$0xff]  ;;  %v619_v35 = vld [vmem:[#allocation8 + $0x20] sm:$0xff]  ;;  %v637_v38 = vld [vmem:[#allocation8 + $0xb0] sm:$0xff] }
  0x92   : > { %490 = vmatmul.mubr.f32.vlgmr.msra.gmra.mrb[0].mxu1 %v1578_v41  ;;  %993 = vmatpush1.bf16.msra.mxu0 %v992_v42  ;;  %v620_v36 = vld [vmem:[#allocation8 + $0x28] sm:$0xff]  ;;  %v638_v39 = vld [vmem:[#allocation8 + $0xb8] sm:$0xff]  ;;  %v639_v44 = vld [vmem:[#allocation8 + $0xc0] sm:$0xff] }
  0x93   : > { %495 = vmatprep.mubr.f32.mxu1 %v1341_v0  ;;  %995 = vmatprep.subr.bf16.mxu0 %v994_v43  ;;  %v1032_v37 = vpack.c.bf16 %v620_v36, %v619_v35  ;;  %v1034_v40 = vpack.c.bf16 %v638_v39, %v637_v38  ;;  %v622_v42 = vld [vmem:[#allocation8 + $0x38] sm:$0xff]  ;;  %v640_v45 = vld [vmem:[#allocation8 + $0xc8] sm:$0xff]  ;;  %v623_v47 = vld [vmem:[#allocation8 + $0x40] sm:$0xff] }
  0x94   : > { %418 = vmatprep.mubr.f32.mxu0 %v1341_v0  ;;  %1025 = vmatpush3.bf16.msra.mxu1 %v1024_v26  ;;  %v1038_v46 = vpack.c.bf16 %v640_v45, %v639_v44  ;;  %v642_v51 = vld [vmem:[#allocation8 + $0xd8] sm:$0xff]  ;;  %v625_v53 = vld [vmem:[#allocation8 + $0x50] sm:$0xff]  ;;  %v644_v57 = vld [vmem:[#allocation8 + $0xe8] sm:$0xff] }
  0x95   : > { %419 = vmatmul.mubr.f32.gmra.mrb[2].mxu0 %v251_v49  ;;  %1027 = vmatprep.subr.bf16.mxu1 %v1026_v29  ;;  %v626_v54 = vld [vmem:[#allocation8 + $0x58] sm:$0xff]  ;;  %v627_v59 = vld [vmem:[#allocation8 + $0x60] sm:$0xff]  ;;  %v628_v60 = vld [vmem:[#allocation8 + $0x68] sm:$0xff] }
  0x96   : > { %496 = vmatmul.mubr.f32.gmra.mrb[2].mxu1 %v251_v49  ;;  %997 = vmatpush1.bf16.msra.mxu0 %v996_v48  ;;  %v624_v48 = vld [vmem:[#allocation8 + $0x48] sm:$0xff]  ;;  %v646_v63 = vld [vmem:[#allocation8 + $0xf8] sm:$0xff]  ;;  %v629_v2 = vld [vmem:[#allocation8 + $0x70] sm:$0xff] }
  0x97   : > { %999 = vmatprep.subr.bf16.mxu0 %v998_v50  ;;  %566 = vmatprep.mubr.f32.mxu0 %v1341_v0  ;;  %v641_v50 = vld [vmem:[#allocation8 + $0xd0] sm:$0xff]  ;;  %v630_v3 = vld [vmem:[#allocation8 + $0x78] sm:$0xff] }
  0x98   : > { %1029 = vmatpush3.bf16.msra.mxu1 %v1028_v32  ;;  %v1042_v52 = vpack.c.bf16 %v642_v51, %v641_v50 }
  0x9a   : > { %1001 = vmatpush1.bf16.msra.mxu0 %v1000_v55  ;;  %v1044_v55 = vpack.c.bf16 %v626_v54, %v625_v53 }
  0x9b   : > { %1003 = vmatprep.subr.bf16.mxu0 %v1002_v56  ;;  %v643_v56 = vld [vmem:[#allocation8 + $0xe0] sm:$0xff] }
  0x9c   : > { %v1046_v58 = vpack.c.bf16 %v644_v57, %v643_v56 }
  0x9e   : > { %1005 = vmatpush1.bf16.msra.mxu0 %v1004_v61  ;;  %v1048_v61 = vpack.c.bf16 %v628_v60, %v627_v59 }
  0x9f   : > { %1007 = vmatprep.subr.bf16.mxu0 %v1006_v62  ;;  %v645_v62 = vld [vmem:[#allocation8 + $0xf0] sm:$0xff] }
  0xa0   : > { %v1050_v1 = vpack.c.bf16 %v646_v63, %v645_v62 }
  0xa2   : > { %1009 = vmatpush1.bf16.msra.mxu0 %v1008_v4  ;;  %v1052_v4 = vpack.c.bf16 %v630_v3, %v629_v2 }
  0xa3   : > { %1011 = vmatprep.subr.bf16.mxu0 %v1010_v5 }
  0xa6   : > { %1013 = vmatpush1.bf16.msra.mxu0 %v1012_v10 }
  0xa7   : > { %1015 = vmatprep.subr.bf16.mxu0 %v1014_v11 }
  0xaa   : > { %1017 = vmatpush1.bf16.msra.mxu0 %v1016_v16 }
  0xab   : > { %1019 = vmatprep.subr.bf16.mxu0 %v1018_v17 }
  0xae   : > { %1021 = vmatpush1.bf16.msra.mxu0 %v1020_v20 }
  0xb1   : > { %567 = vmatmul.mubr.f32.vlgmr.msra.gmra.mrb[4].mxu0 %v1578_v41  ;;  %v621_v41 = vld [vmem:[#allocation8 + $0x30] sm:$0xff] }
  0xb2   : > { %572 = vmatprep.mubr.f32.mxu0 %v1341_v0  ;;  %v1030_v0 = vpack.c.bf16 %v636_v34, %v635_v33  ;;  %v1036_v43 = vpack.c.bf16 %v622_v42, %v621_v41 }
  0xb4   : > { %1031 = vmatprep.subr.bf16.mxu1 %v1030_v0 }
  0xb5   : > { %573 = vmatmul.mubr.f32.gmra.mrb[6].mxu0 %v251_v49  ;;  %1033 = vmatpush3.bf16.msra.mxu1 %v1032_v37  ;;  %v1040_v49 = vpack.c.bf16 %v624_v48, %v623_v47 }
  0xb6   : > { %1035 = vmatprep.subr.bf16.mxu1 %v1034_v40 }
  0xb9   : > { %1037 = vmatpush3.bf16.msra.mxu1 %v1036_v43 }
  0xba   : > { %1039 = vmatprep.subr.bf16.mxu1 %v1038_v46 }
  0xbd   : > { %1041 = vmatpush3.bf16.msra.mxu1 %v1040_v49 }
  0xbe   : > { %1043 = vmatprep.subr.bf16.mxu1 %v1042_v52 }
  0xc1   : > { %1045 = vmatpush3.bf16.msra.mxu1 %v1044_v55 }
  0xc2   : > { %1047 = vmatprep.subr.bf16.mxu1 %v1046_v58 }
  0xc5   : > { %1049 = vmatpush3.bf16.msra.mxu1 %v1048_v61 }
  0xc6   : > { %1051 = vmatprep.subr.bf16.mxu1 %v1050_v1 }
  0xc9   : > { %1053 = vmatpush3.bf16.msra.mxu1 %v1052_v4 }
 0x164   : > { %v414_v5 = vpop.f32.mrb[0].mxu0 }
 0x165   : > { %v491_v6 = vpop.f32.mrb[0].mxu1  ;;  %v416_v7 = vpop.f32.mrb[1].mxu0 }
 0x166   : > { %v877_v8 = vmul.f32 -1.442695, %v491_v6  ;;  %v493_v9 = vpop.f32.mrb[1].mxu1 }
 0x167   : > { %v878_v10 = vmul.f32 -1.442695, %v493_v9 }
 0x168   : > { %1144 = vpow2.f32 %v877_v8  ;;  %v420_v11 = vpop.f32.mrb[2].mxu0 }
 0x169   : > { %1146 = vpow2.f32 %v878_v10  ;;  %v497_v12 = vpop.f32.mrb[2].mxu1  ;;  %v422_v13 = vpop.f32.mrb[3].mxu0 }
 0x16a   : > { %v879_v14 = vmul.f32 -1.442695, %v497_v12  ;;  %v499_v15 = vpop.f32.mrb[3].mxu1 }
 0x16b   : > { %v880_v16 = vmul.f32 -1.442695, %v499_v15 }
 0x16c   : > { %1148 = vpow2.f32 %v879_v14 }
 0x16d   : > { %1150 = vpow2.f32 %v880_v16 }
 0x172   : > { %v1145_v17 = vpop.eup %1144 }
 0x173   : > { %v1147_v18 = vpop.eup %1146  ;;  %v591_v19 = vadd.f32 1.0, %v1145_v17 }
 0x174   : > { %v592_v20 = vadd.f32 1.0, %v1147_v18 }
 0x175   : > { %1152 = vrcp.f32 %v591_v19 }
 0x176   : > { %v1149_v21 = vpop.eup %1148  ;;  %1154 = vrcp.f32 %v592_v20 }
 0x177   : > { %v1151_v22 = vpop.eup %1150  ;;  %v593_v23 = vadd.f32 1.0, %v1149_v21 }
 0x178   : > { %v594_v24 = vadd.f32 1.0, %v1151_v22 }
 0x179   : > { %1156 = vrcp.f32 %v593_v23 }
 0x17a   : > { %1158 = vrcp.f32 %v594_v24 }
 0x17f   : > { %v1153_v25 = vpop.eup %1152 }
 0x180   : > { %v1155_v26 = vpop.eup %1154  ;;  %v603_v27 = vmul.f32 %v1153_v25, %v491_v6 }
 0x181   : > { %v604_v28 = vmul.f32 %v1155_v26, %v493_v9 }
 0x182   : > { %v607_v29 = vmul.f32 %v603_v27, %v414_v5 }
 0x183   : > { %v1157_v30 = vpop.eup %1156  ;;  %v608_v31 = vmul.f32 %v604_v28, %v416_v7 }
 0x184   : > { %v1159_v32 = vpop.eup %1158  ;;  %v605_v33 = vmul.f32 %v1157_v30, %v497_v12  ;;  %v568_v34 = vpop.f32.mrb[4].mxu0 }
 0x185   : > { %v606_v0 = vmul.f32 %v1159_v32, %v499_v15  ;;  %v611_v35 = vmul.f32 %v607_v29, %v568_v34  ;;  %v570_v36 = vpop.f32.mrb[5].mxu0 }
 0x186   : > { %v609_v37 = vmul.f32 %v605_v33, %v420_v11  ;;  %v612_v38 = vmul.f32 %v608_v31, %v570_v36 }
 0x187   : > { %v610_v39 = vmul.f32 %v606_v0, %v422_v13 }
 0x188   : > { %v574_v40 = vpop.f32.mrb[6].mxu0  ;;  %711 = vmatprep.mubr.f32.mxu1 %v612_v38 }
 0x189   : > { %v613_v41 = vmul.f32 %v609_v37, %v574_v40  ;;  %v576_v42 = vpop.f32.mrb[7].mxu0  ;;  %712 = vmatmul.mubr.f32.vlgmr.msra.gmra.mrb[4].mxu1 %v611_v35 }
 0x18a   : > { %v614_v43 = vmul.f32 %v610_v39, %v576_v42 }
 0x18c   : > { %716 = vmatprep.mubr.f32.mxu1 %v614_v43 }
 0x18d   : > { %717 = vmatmul.mubr.f32.gmra.mrb[6].mxu1 %v613_v41 }
 0x25c   : > { %v920_v44 = vpop.f32.mrb[4].mxu1 }
 0x25d   : > { %v921_v45 = vpop.f32.mrb[5].mxu1 }
 0x25e   : > { %v922_v46 = vadd.f32 %v921_v45, %v920_v44 }
 0x260   : > { %743 = vst [vmem:[%s245_s20] sm:$0xff] %v922_v46  ;;  %v923_v47 = vpop.f32.mrb[6].mxu1 }
 0x261   : > { %v924_v48 = vpop.f32.mrb[7].mxu1 }
 0x262   : > { %v925_v49 = vadd.f32 %v924_v48, %v923_v47 }
 0x264   : > { %744 = vst [vmem:[%s245_s20 + $0x8] sm:$0xff] %v925_v49 }
 0x265   : > { %1259 = shalt.err (!%p1256_p11)
}
 0x266   : > { %s1260_s21 = scalar_lea.hbm %s1596_s8, 256  ;;  %s1264_s4 = scalar_lea.hbm %s1648_s3, 512 }
 0x267   : > { %p1261_p0 = scmp.ne.s32.totalorder %s1596_s8, %s1260_s21  ;;  %p1265_p6 = scmp.lt.u32.totalorder %s1596_s8, %s1648_s3 }
 0x268   : > { %p1266_p7 = scmp.lt.u32.totalorder %s1264_s4, %s1260_s21  ;;  %p1268_p8 = scmp.lt.u32.totalorder %s1260_s21, %s1596_s8 }
 0x269   : > { %p1262_p4 = pnand %p1261_p0, %p1663_p12 }
 0x26a   : > { %p1267_p2 = por %p1266_p7, %p1265_p6 }
 0x26b   : > { %p1263_p13 = pneg %p1262_p4 }
 0x26c   : > { %p1269_p1 = por %p1268_p8, %p1267_p2 }
 0x26e   : > { %p1270_p10 = pnand %p1269_p1, %p1263_p13 }
 0x270   : > { %1273 = shalt.err (!%p1270_p10)
}
 0x271   : > { %s1343_s20 = smov 128   ;;  %s1344_s24 = smov 8  }
 0x272   : > { %1064 = dma.vmem_to_hbm [thread:$0]  (%p1663_p12), %s1591_s22, 256, %s1596_s8, %s746_s26, %s1343_s20, %s1343_s20, %s1344_s24  }
 0x273 PF: > { %s774_s9 = sand.u32 1, %s1312_s12   ;;  %p1664_p3 = scmp.ne.s32.totalorder %s1656_s23, 0 }
 0x274   : > { %p1665_p5 = scmp.ge.s32.totalorder %s1332_s17, 2  ;;  %s775_s10 = scalar_lea.sflag [#allocation5], %s774_s9 }
 0x276   : > { %p1078_p9 = pnand %p1665_p5, %p1664_p3 }
 0x278   : > { %1307 = dma.done.wait (!%p1078_p9), %s775_s10, 256  }
 0x279   : > { %1309 = vsyncadd (!%p1078_p9), %s775_s10, 4294967040  ;;  %s20_s17 = sadd.s32 1, %s1332_s17   ;;  %s1666_s12 = smov %s1316_s13 }
 0x27a   : > { %p17_p11 = scmp.ge.s32.totalorder %s20_s17, 4   ;;  %s1667_s13 = smov %s1320_s14 }
 0x27b   : > { %s1668_s14 = smov %s1510_s5  ;;  %s1669_s15 = smov %s1328_s16 }
 0x27c   : > { %s1670_s16 = smov %s1672_s19  ;;  %19 = sbr.rel (!%p17_p11) target bundleno = 7 (0x7), region = 99 }
 0x283   :  { %780 = vsyncpa [#allocation4], 1 }
 0x284   :  { %782 = vsyncpa [#allocation4 + $0x1], 1 }
 0x285   :  { %783 = vsyncpa [#allocation7], 1 }
 0x286   :  { %784 = vsyncpa [#allocation5], 1 }
 0x287   :  { %786 = vsyncpa [#allocation5 + $0x1], 1 }

</bundles_post_ra>
